<compile_context>
chip_gen: v6e
topology: v6e:2x2x1
jax: 0.10.0
libtpu: 0.0.40
codegen_flags: <defaults>
</compile_context>

<pallas_src>
import jax
import jax.numpy as jnp
from jax.experimental import pallas as pl
from jax.experimental.pallas import tpu as pltpu


def _encoder_kernel(u_ref, y_ref, wu_ref, wy_ref, b_ref, o_ref):
    # Two MXU pushes into one f32 accumulator, then bias (VPU) + tanh (EUP).
    # Normalization is already folded into wu/wy/b by the wrapper.
    acc = jnp.dot(u_ref[...], wu_ref[...], preferred_element_type=jnp.float32)
    acc = acc + jnp.dot(y_ref[...], wy_ref[...],
                        preferred_element_type=jnp.float32)
    o_ref[...] = jnp.tanh(acc + b_ref[...])


def _pick_batch_tile(B, block_b):
    """Batch tile: as big as block_b allows, multiple of 8 when tiling,
    >=2 grid steps when the batch cleanly allows it (keeps both v7x TCs busy,
    no-op on single-TC v5e/v6e)."""
    if B <= block_b:
        half = B // 2
        if half >= 8 and half % 8 == 0 and B % 2 == 0:
            return half          # two even, sublane-aligned tiles, no padding
        return B                 # one full-extent block, no padding
    tb = min(block_b, B // 2)    # large batch: big tiles, >=2 steps
    return max(8, (tb // 8) * 8)


def io_normalization_encoder(upast, ypast, umean, ustd, ymean, ystd,
                             Wu, Wy, b, *, block_b=8192,
                             bf16_activations=False):
    """upast: (B, Tu, nu), ypast: (B, Ty, ny) -> (B, nx) float32."""
    B, Tu, nu = upast.shape
    _, Ty, ny = ypast.shape
    nx = Wu.shape[1]
    Ku, Ky = Tu * nu, Ty * ny
    f32 = jnp.float32
    act_dt = jnp.bfloat16 if bf16_activations else f32

    # --- flatten histories (contiguous reshape, no HBM copy; NO concat) ---
    xu = upast.reshape(B, Ku).astype(act_dt)
    xy = ypast.reshape(B, Ky).astype(act_dt)

    # --- fold (x - mean)/std into the linear head (exact: head is linear) ---
    # NOTE: valid only because `fun` is linear in its normalized inputs; a
    # nonlinear `fun` would require keeping the normalization explicit.
    inv_us = 1.0 / ustd.astype(f32)
    inv_ys = 1.0 / ystd.astype(f32)
    us_t = jnp.tile(inv_us, Tu)                    # (Ku,)
    ys_t = jnp.tile(inv_ys, Ty)                    # (Ky,)
    um_t = jnp.tile(umean.astype(f32), Tu)         # (Ku,)
    ym_t = jnp.tile(ymean.astype(f32), Ty)         # (Ky,)
    Wu32, Wy32 = Wu.astype(f32), Wy.astype(f32)
    Wu_f = (Wu32 * us_t[:, None]).astype(act_dt)   # (Ku, nx)
    Wy_f = (Wy32 * ys_t[:, None]).astype(act_dt)   # (Ky, nx)
    b_f = (b.astype(f32)
           - (um_t * us_t) @ Wu32
           - (ym_t * ys_t) @ Wy32).reshape(1, nx)  # (1, nx) f32

    # --- batch tiling (pad only if B does not divide evenly) ---
    tb = _pick_batch_tile(B, block_b)
    B_pad = -(-B // tb) * tb
    if B_pad != B:
        xu = jnp.pad(xu, ((0, B_pad - B), (0, 0)))
        xy = jnp.pad(xy, ((0, B_pad - B), (0, 0)))
    grid = (B_pad // tb,)

    itm = jnp.dtype(act_dt).itemsize
    cost = pl.CostEstimate(
        flops=2 * B_pad * (Ku + Ky) * nx,
        transcendentals=B_pad * nx,
        bytes_accessed=(B_pad * (Ku + Ky) * itm        # activations in
                        + (Ku + Ky) * nx * itm          # weights
                        + nx * 4                        # bias
                        + B_pad * nx * 4))              # output

    out = pl.pallas_call(
        _encoder_kernel,
        out_shape=jax.ShapeDtypeStruct((B_pad, nx), f32),
        grid_spec=pltpu.PrefetchScalarGridSpec(
            num_scalar_prefetch=0,
            grid=grid,
            in_specs=[
                pl.BlockSpec((tb, Ku), lambda i: (i, 0)),   # u history tile
                pl.BlockSpec((tb, Ky), lambda i: (i, 0)),   # y history tile
                pl.BlockSpec((Ku, nx), lambda i: (0, 0)),   # resident Wu'
                pl.BlockSpec((Ky, nx), lambda i: (0, 0)),   # resident Wy'
                pl.BlockSpec((1, nx), lambda i: (0, 0)),    # resident bias
            ],
            out_specs=pl.BlockSpec((tb, nx), lambda i: (i, 0)),
        ),
        compiler_params=pltpu.CompilerParams(
            dimension_semantics=("parallel",)),
        cost_estimate=cost,
    )(xu, xy, Wu_f, Wy_f, b_f)
    return out[:B] if B_pad != B else out


def _reference(upast, ypast, umean, ustd, ymean, ystd, Wu, Wy, b):
    B = upast.shape[0]
    un = (upast - umean) / ustd
    yn = (ypast - ymean) / ystd
    z = jnp.concatenate([un.reshape(B, -1), yn.reshape(B, -1)], axis=1)
    W = jnp.concatenate([Wu, Wy], axis=0)
    return jnp.tanh(z @ W + b)


if __name__ == "__main__":
    key = jax.random.PRNGKey(0)
    B, Tu, nu, Ty, ny, nx = 2, 8, 4, 8, 3, 32

    k = jax.random.split(key, 8)
    upast = jax.random.normal(k[0], (B, Tu, nu), dtype=jnp.float32)
    ypast = jax.random.normal(k[1], (B, Ty, ny), dtype=jnp.float32)

    # deterministic per-channel normalization constants (as in the module)
    umean = jnp.linspace(-0.5, 0.5, nu, dtype=jnp.float32)
    ustd = jnp.linspace(0.8, 1.2, nu, dtype=jnp.float32)
    ymean = jnp.linspace(-0.3, 0.3, ny, dtype=jnp.float32)
    ystd = jnp.linspace(0.9, 1.1, ny, dtype=jnp.float32)

    # deterministic encoder (`fun`) parameters
    Wu = 0.1 * jax.random.normal(k[2], (Tu * nu, nx), dtype=jnp.float32)
    Wy = 0.1 * jax.random.normal(k[3], (Ty * ny, nx), dtype=jnp.float32)
    b = 0.01 * jax.random.normal(k[4], (nx,), dtype=jnp.float32)

    out = io_normalization_encoder(upast, ypast, umean, ustd, ymean, ystd,
                                   Wu, Wy, b)
    out = jax.block_until_ready(out)

    ref = _reference(upast, ypast, umean, ustd, ymean, ystd, Wu, Wy, b)
    assert out.shape == (B, nx)
    assert jnp.allclose(out, ref, atol=1e-5, rtol=1e-5)

    print("KERNEL_OK")
</pallas_src>

<mosaic_0001>
module attributes {stable_mosaic.version = 11 : i64} {
  func.func @_encoder_kernel(%arg0: i32, %arg1: memref<2x32xf32, #tpu.memory_space<vmem>>, %arg2: memref<2x24xf32, #tpu.memory_space<vmem>>, %arg3: memref<32x32xf32, #tpu.memory_space<vmem>>, %arg4: memref<24x32xf32, #tpu.memory_space<vmem>>, %arg5: memref<1x32xf32, #tpu.memory_space<vmem>>, %arg6: memref<2x32xf32, #tpu.memory_space<vmem>>) attributes {dimension_semantics = [#tpu.dimension_semantics<parallel>], iteration_bounds = array<i64: 1>, scalar_prefetch = 0 : i64, scratch_operands = 0 : i64, tpu.core_type = #tpu.core_type<tc>, window_params = [{transform_indices = @transform_0, window_bounds = array<i64: 2, 32>}, {transform_indices = @transform_1, window_bounds = array<i64: 2, 24>}, {pipeline_mode = #tpu.pipeline_mode<synchronous>, transform_indices = @transform_2, window_bounds = array<i64: 32, 32>}, {pipeline_mode = #tpu.pipeline_mode<synchronous>, transform_indices = @transform_3, window_bounds = array<i64: 24, 32>}, {pipeline_mode = #tpu.pipeline_mode<synchronous>, transform_indices = @transform_4, window_bounds = array<i64: 1, 32>}, {transform_indices = @transform_5, window_bounds = array<i64: 2, 32>}]} {
    %c0 = arith.constant 0 : index
    %c0_0 = arith.constant 0 : index
    %0 = vector.load %arg1[%c0, %c0_0] : memref<2x32xf32, #tpu.memory_space<vmem>>, vector<2x32xf32>
    %c0_1 = arith.constant 0 : index
    %c0_2 = arith.constant 0 : index
    %1 = vector.load %arg3[%c0_1, %c0_2] : memref<32x32xf32, #tpu.memory_space<vmem>>, vector<32x32xf32>
    %cst = arith.constant dense<0.000000e+00> : vector<2x32xf32>
    %2 = tpu.matmul %0, %1, %cst {dimension_numbers = #tpu.dot_dimension_numbers<[1], [0], [0], [1], [0, 0, 1, 1], [], []>} : vector<2x32xf32>, vector<32x32xf32>, vector<2x32xf32> -> vector<2x32xf32>
    %c0_3 = arith.constant 0 : index
    %c0_4 = arith.constant 0 : index
    %3 = vector.load %arg2[%c0_3, %c0_4] : memref<2x24xf32, #tpu.memory_space<vmem>>, vector<2x24xf32>
    %c0_5 = arith.constant 0 : index
    %c0_6 = arith.constant 0 : index
    %4 = vector.load %arg4[%c0_5, %c0_6] : memref<24x32xf32, #tpu.memory_space<vmem>>, vector<24x32xf32>
    %cst_7 = arith.constant dense<0.000000e+00> : vector<2x32xf32>
    %5 = tpu.matmul %3, %4, %cst_7 {dimension_numbers = #tpu.dot_dimension_numbers<[1], [0], [0], [1], [0, 0, 1, 1], [], []>} : vector<2x24xf32>, vector<24x32xf32>, vector<2x32xf32> -> vector<2x32xf32>
    %6 = arith.addf %2, %5 : vector<2x32xf32>
    %c0_8 = arith.constant 0 : index
    %c0_9 = arith.constant 0 : index
    %7 = vector.load %arg5[%c0_8, %c0_9] : memref<1x32xf32, #tpu.memory_space<vmem>>, vector<1x32xf32>
    %8 = vector.broadcast %7 : vector<1x32xf32> to vector<2x32xf32>
    %9 = arith.addf %6, %8 : vector<2x32xf32>
    %10 = math.tanh %9 : vector<2x32xf32>
    %c0_10 = arith.constant 0 : index
    %c0_11 = arith.constant 0 : index
    %11 = vector.load %arg6[%c0_10, %c0_11] : memref<2x32xf32, #tpu.memory_space<vmem>>, vector<2x32xf32>
    tpu.vector_store %arg6[%c0_10, %c0_11], %10 {strides = array<i32>} : memref<2x32xf32, #tpu.memory_space<vmem>>, vector<2x32xf32>,
    return
  }
  func.func @transform_0(%arg0: i32) -> (i32, i32) {
    %c0_i32 = arith.constant 0 : i32
    %c0_i32_0 = arith.constant 0 : i32
    return %arg0, %c0_i32 : i32, i32
  }
  func.func @transform_1(%arg0: i32) -> (i32, i32) {
    %c0_i32 = arith.constant 0 : i32
    %c0_i32_0 = arith.constant 0 : i32
    return %arg0, %c0_i32 : i32, i32
  }
  func.func @transform_2(%arg0: i32) -> (i32, i32) {
    %c0_i32 = arith.constant 0 : i32
    %c0_i32_0 = arith.constant 0 : i32
    %c0_i32_1 = arith.constant 0 : i32
    return %c0_i32, %c0_i32_0 : i32, i32
  }
  func.func @transform_3(%arg0: i32) -> (i32, i32) {
    %c0_i32 = arith.constant 0 : i32
    %c0_i32_0 = arith.constant 0 : i32
    %c0_i32_1 = arith.constant 0 : i32
    return %c0_i32, %c0_i32_0 : i32, i32
  }
  func.func @transform_4(%arg0: i32) -> (i32, i32) {
    %c0_i32 = arith.constant 0 : i32
    %c0_i32_0 = arith.constant 0 : i32
    %c0_i32_1 = arith.constant 0 : i32
    return %c0_i32, %c0_i32_0 : i32, i32
  }
  func.func @transform_5(%arg0: i32) -> (i32, i32) {
    %c0_i32 = arith.constant 0 : i32
    %c0_i32_0 = arith.constant 0 : i32
    return %arg0, %c0_i32 : i32, i32
  }
}

</mosaic_0001>

<bundles_post_ra>
// kernel: tpu_custom_call.1
= control target key start
LH: loop header
LB: loop body
LE: loop exit
PB: predicated region body
PF: predicated region fallthrough
CT: control target
= control target key end

     0   :  { %10 = vsyncpa [#allocation3], 0  ;;  %s465_s0 = inlined_call_operand.hbm [shape: f32[2,32], index: 0, kind: input, shape index: {}]   ;;  %s466_s1 = inlined_call_operand.hbm [shape: f32[2,24], index: 1, kind: input, shape index: {}]   ;;  %s467_s2 = inlined_call_operand.hbm [shape: f32[32,32], index: 2, kind: input, shape index: {}]   ;;  %s468_s3 = inlined_call_operand.hbm [shape: f32[24,32], index: 3, kind: input, shape index: {}]   ;;  %s469_s4 = inlined_call_operand.vmem [shape: f32[1,32], index: 4, kind: input, shape index: {}]   ;;  %s470_s5 = inlined_call_operand.hbm [shape: f32[2,32], index: 5, kind: output, shape index: {}]  }
   0x1   :  { %11 = vsyncpa [#allocation6], 0 }
   0x2   :  { %12 = vsyncpa [#allocation9], 0 }
   0x3   :  { %13 = vsyncpa [#allocation4], 0  ;;  %s408_s18 = smov [#allocation5]   ;;  %s409_s20 = smov [#allocation2]  }
   0x4   :  { %s30_s19 = sshll.u32 %s408_s18, 4  ;;  %s20_s21 = sshll.u32 %s409_s20, 4  ;;  %s31_s19 = int_to_ptr.vmem [resolvable:$true] %s30_s19  ;;  %s21_s21 = int_to_ptr.vmem [resolvable:$true] %s20_s21 }
   0x5   :  { %s308_s22 = scalar_lea.vmem %s31_s19, 32  ;;  %p313_p1 = scmp.lt.s32.totalorder %s31_s19, %s31_s19 }
   0x6   :  { %p309_p0 = scmp.ne.s32.totalorder %s31_s19, %s308_s22  ;;  %p314_p2 = scmp.lt.s32.totalorder %s308_s22, %s308_s22 }
   0x8   :  { %p315_p3 = por %p314_p2, %p313_p1 }
   0xa   :  { %p316_p4 = pnand %p315_p3, %p309_p0 }
   0xc   :  { %319 = shalt.err (!%p316_p4)
}
   0xd   :  { %33 = dma.hbm_to_vmem [thread:$0]  %s466_s1, 32, %s31_s19, [#allocation6]  }
   0xe   :  { %s328_s25 = scalar_lea.vmem %s21_s21, 32  ;;  %p333_p6 = scmp.lt.s32.totalorder %s21_s21, %s21_s21 }
   0xf   :  { %p329_p5 = scmp.ne.s32.totalorder %s21_s21, %s328_s25  ;;  %p334_p7 = scmp.lt.s32.totalorder %s328_s25, %s328_s25 }
  0x11   :  { %p335_p8 = por %p334_p7, %p333_p6 }
  0x13   :  { %p336_p9 = pnand %p335_p8, %p329_p5 }
  0x15   :  { %339 = shalt.err (!%p336_p9)
}
  0x16   :  { %23 = dma.hbm_to_vmem [thread:$0]  %s465_s0, 32, %s21_s21, [#allocation3]  }
  0x17   :  { %s410_s28 = smov [#allocation7]  }
  0x18   :  { %s39_s29 = sshll.u32 %s410_s28, 4  ;;  %s40_s29 = int_to_ptr.vmem [resolvable:$true] %s39_s29 }
  0x19   :  { %s348_s30 = scalar_lea.vmem %s40_s29, 512  ;;  %p353_p11 = scmp.lt.s32.totalorder %s40_s29, %s40_s29 }
  0x1a   :  { %p349_p10 = scmp.ne.s32.totalorder %s40_s29, %s348_s30  ;;  %p354_p12 = scmp.lt.s32.totalorder %s348_s30, %s348_s30 }
  0x1c   :  { %p355_p13 = por %p354_p12, %p353_p11 }
  0x1e   :  { %p356_p0 = pnand %p355_p13, %p349_p10 }
  0x20   :  { %359 = shalt.err (!%p356_p0)
}
  0x21   :  { %s411_s1 = smov 128   ;;  %s412_s6 = smov 8  }
  0x22   :  { %45 = dma.hbm_to_vmem [thread:$0]  %s467_s2, 512, %s40_s29, [#allocation6], %s411_s1, %s411_s1, %s412_s6  }
  0x23   :  { %s413_s9 = smov [#allocation8]  }
  0x24   :  { %s51_s10 = sshll.u32 %s413_s9, 4  ;;  %s52_s10 = int_to_ptr.vmem [resolvable:$true] %s51_s10 }
  0x25   :  { %s368_s0 = scalar_lea.vmem %s52_s10, 384  ;;  %p373_p2 = scmp.lt.s32.totalorder %s52_s10, %s52_s10 }
  0x26   :  { %p369_p1 = scmp.ne.s32.totalorder %s52_s10, %s368_s0  ;;  %p374_p3 = scmp.lt.s32.totalorder %s368_s0, %s368_s0 }
  0x28   :  { %p375_p4 = por %p374_p3, %p373_p2 }
  0x2a   :  { %p376_p5 = pnand %p375_p4, %p369_p1 }
  0x2c   :  { %379 = shalt.err (!%p376_p5)
}
  0x2d   :  { %57 = dma.hbm_to_vmem [thread:$0]  %s468_s3, 384, %s52_s10, [#allocation9], %s411_s1, %s411_s1, %s412_s6  }
  0x2e   :  { %400 = dma.done.wait [#allocation3], 32  }
  0x2f   :  { %401 = vsyncadd [#allocation3], 4294967264 }
  0x30   :  { %402 = dma.done.wait [#allocation6], 544  }
  0x31   :  { %403 = vsyncadd [#allocation6], 4294966752 }
  0x32   :  { %404 = dma.done.wait [#allocation9], 384  }
  0x33   :  { %405 = vsyncadd [#allocation9], 4294966912  ;;  %v414_v0 = vmov 0.0   ;;  %vm415_vm0 = vmmov 0   ;;  %v80_v1 = vld [vmem:[#allocation8 + $0x10] sm:$0xff]  ;;  %v76_v2 = vld [vmem:[#allocation7 + $0x18] sm:$0xff] }
  0x34   :  { %269 = vmatprep.subr.mxu0 %v414_v0  ;;  %278 = vmatprep.subr.mxu1 %v414_v0  ;;  %v79_v3 = vld [vmem:[#allocation8 + $0x8] sm:$0xff]  ;;  %v75_v4 = vld [vmem:[#allocation7 + $0x10] sm:$0xff]  ;;  %v78_v5 = vld [vmem:[#allocation8] sm:$0xff]  ;;  %vm81_vm1 = vcmask 195584   ;;  %vm155_vm2 = vcmask 261120   ;;  %s416_s13 = smov [#allocation10]  }
  0x35   :  { %275 = vmatprep.mubr.msk.f32.mxu0 %vm415_vm0, %v414_v0  ;;  %286 = vmatprep.mubr.msk.f32.mxu1 %vm415_vm0, %v414_v0  ;;  %v74_v6 = vld [vmem:[#allocation7 + $0x8] sm:$0xff]  ;;  %v77_v7 = vld [vmem:[#allocation5] sm:$0x3]  ;;  %v73_v8 = vld [vmem:[#allocation7] sm:$0xff]  ;;  %s246_s14 = sshll.u32 %s416_s13, 4  ;;  %vm238_vm3 = vcmask 254976   ;;  %s247_s14 = int_to_ptr.vmem [resolvable:$true] %s246_s14 }
  0x36   :  { %270 = vmatpush3.msra.mxu0 %v80_v1  ;;  %279 = vmatpush3.msra.mxu1 %v76_v2  ;;  %v72_v9 = vld [vmem:[#allocation2] sm:$0x3]  ;;  %s380_s15 = scalar_lea.vmem %s247_s14, 32  ;;  %p385_p7 = scmp.lt.s32.totalorder %s247_s14, %s247_s14 }
  0x37   :  { %271 = vmatprep.subr.mxu0 %v414_v0  ;;  %280 = vmatprep.subr.mxu1 %v414_v0  ;;  %v259_v13 = vld [vmem:[%s469_s4] ss:$0 sm:$0xff]  ;;  %p381_p6 = scmp.ne.s32.totalorder %s247_s14, %s380_s15  ;;  %p386_p8 = scmp.lt.s32.totalorder %s380_s15, %s380_s15 }
  0x38   :  { %272 = vmatpush3.msra.mxu0 %v79_v3  ;;  %281 = vmatpush3.msra.mxu1 %v75_v4 }
  0x39   :  { %273 = vmatprep.subr.mxu0 %v414_v0  ;;  %282 = vmatprep.subr.mxu1 %v414_v0  ;;  %p387_p9 = por %p386_p8, %p385_p7 }
  0x3a   :  { %274 = vmatpush3.msra.mxu0 %v78_v5  ;;  %283 = vmatpush3.msra.mxu1 %v74_v6 }
  0x3b   :  { %276 = vmatmul.mubr.msk.f32.vlgmr.msra.gmra.mxu0 %vm81_vm1, %v77_v7  ;;  %284 = vmatprep.subr.mxu1 %v414_v0  ;;  %p388_p10 = pnand %p387_p9, %p381_p6 }
  0x3c   :  { %285 = vmatpush3.msra.mxu1 %v73_v8 }
  0x3d   :  { %287 = vmatmul.mubr.msk.f32.vlgmr.msra.gmra.mxu1 %vm155_vm2, %v72_v9 }
  0xfb   :  { %v151_v10 = vpop.f32.mrf.mxu0 }
  0xfd   :  { %v277_v11 = vpop.f32.mrf.mxu0  ;;  %v225_v12 = vpop.f32.mrf.mxu1 }
  0xfe   :  { %v226_v14 = vadd.f32 %v225_v12, %v151_v10 }
  0xff   :  { %v288_v15 = vpop.f32.mrf.mxu1 }
 0x100   :  { %v236_v16 = vadd.f32 %v259_v13, %v226_v14 }
 0x102   :  { %298 = vtanh.f32 %v236_v16 }
 0x10f   :  { %v299_v17 = vpop.eup %298 }
 0x110   :  { %239 = vst.msk [vmem:[#allocation10] sm:$0x3] %vm238_vm3, %v299_v17 }
 0x111   :  { %391 = shalt.err (!%p388_p10)
}
 0x112   :  { %249 = dma.vmem_to_hbm [thread:$0]  %s247_s14, 32, %s470_s5, [#allocation4]  }
 0x113   :  { %406 = dma.done.wait [#allocation4], 32  }
 0x114   :  { %407 = vsyncadd [#allocation4], 4294967264 }
 0x115   :  { %253 = vsyncpa [#allocation3], 1 }
 0x116   :  { %254 = vsyncpa [#allocation6], 1 }
 0x117   :  { %255 = vsyncpa [#allocation9], 1 }
 0x118   :  { %256 = vsyncpa [#allocation4], 1 }

</bundles_post_ra>
